<compile_context>
chip_gen: v6e
topology: v6e:2x2x1
jax: 0.10.0
libtpu: 0.0.40
codegen_flags: <defaults>
</compile_context>

<pallas_src>
import functools

import jax
import jax.numpy as jnp
from jax.experimental import pallas as pl
from jax.experimental.pallas import tpu as pltpu

LANE = 128
SUBLANE = 8


def _round_up(x, m):
    return ((x + m - 1) // m) * m


def actor_kernel(x_ref, w1_ref, b1_ref, w2_ref, b2_ref, w3_ref, b3_ref,
                 probs_ref):
    # Activations in bf16 feed the MXU; accumulate in f32.
    x = x_ref[...].astype(jnp.bfloat16)

    # fc1 + ReLU
    h1 = jnp.dot(x, w1_ref[...], preferred_element_type=jnp.float32)
    h1 = jnp.maximum(h1 + b1_ref[...], 0.0).astype(jnp.bfloat16)

    # fc2 + ReLU
    h2 = jnp.dot(h1, w2_ref[...], preferred_element_type=jnp.float32)
    h2 = jnp.maximum(h2 + b2_ref[...], 0.0).astype(jnp.bfloat16)

    # pi head (logits); padded lanes carry a -1e30 bias -> ~0 after softmax.
    logits = jnp.dot(h2, w3_ref[...], preferred_element_type=jnp.float32)
    logits = logits + b3_ref[...]

    # Numerically-stable softmax over the (padded, lane-dense) action dim.
    m = jnp.max(logits, axis=-1, keepdims=True)
    e = jnp.exp(logits - m)
    denom = jnp.sum(e, axis=-1, keepdims=True)
    probs_ref[...] = e * pl.reciprocal(denom, approx=True)

    # TODO(synk): Categorical sampling / log_prob (Gumbel-max via
    # pltpu.prng_seed/prng_random_bits) could be fused here; kept host-side to
    # mirror the PyTorch module, which returns a distribution over probs.


def prepare_params(params):
    """One-time prep: bf16 weights, f32 row-biases, lane-padded pi head.

    Returns (prepared_tuple, n_actions). Do this once, outside the hot loop,
    so the per-call path is just the pallas_call.
    """
    w1, b1, w2, b2, w3, b3 = params
    fc1 = w1.shape[1]
    fc2 = w2.shape[1]
    n_actions = w3.shape[1]

    n_pad = _round_up(max(n_actions, LANE), LANE)
    w3p = jnp.zeros((fc2, n_pad), jnp.bfloat16).at[:, :n_actions].set(
        w3.astype(jnp.bfloat16))
    b3p = jnp.full((1, n_pad), -1e30, jnp.float32).at[:, :n_actions].set(
        jnp.reshape(b3, (1, n_actions)).astype(jnp.float32))

    prepared = (
        w1.astype(jnp.bfloat16),
        jnp.reshape(b1, (1, fc1)).astype(jnp.float32),
        w2.astype(jnp.bfloat16),
        jnp.reshape(b2, (1, fc2)).astype(jnp.float32),
        w3p,
        b3p,
    )
    return prepared, n_actions


@functools.partial(jax.jit, static_argnames=("n_actions", "block_b"))
def actor_forward(state, prepared, *, n_actions, block_b=256):
    """state: [B, input_dim] float32 -> softmax action probs [B, n_actions]."""
    w1b, b1r, w2b, b2r, w3p, b3p = prepared
    B, input_dim = state.shape
    n_pad = w3p.shape[1]

    # Batch tiling: sublane-aligned tile, pad batch to a whole number of tiles.
    tb = min(block_b, _round_up(B, SUBLANE))
    Bp = _round_up(B, tb)
    if Bp != B:
        state = jnp.pad(state, ((0, Bp - B), (0, 0)))
    grid = (Bp // tb,)

    def resident(shape):
        # Weights / biases: same block for every batch tile (stay in VMEM,
        # fetched once).
        return pl.BlockSpec(shape, lambda i: (0, 0))

    out = pl.pallas_call(
        actor_kernel,
        out_shape=jax.ShapeDtypeStruct((Bp, n_pad), jnp.float32),
        grid=grid,
        in_specs=[
            pl.BlockSpec((tb, input_dim), lambda i: (i, 0)),   # state tile
            resident(w1b.shape), resident(b1r.shape),
            resident(w2b.shape), resident(b2r.shape),
            resident(w3p.shape), resident(b3p.shape),
        ],
        out_specs=pl.BlockSpec((tb, n_pad), lambda i: (i, 0)),
        compiler_params=pltpu.CompilerParams(
            dimension_semantics=("parallel",)),
    )(state, w1b, b1r, w2b, b2r, w3p, b3p)

    return out[:B, :n_actions]


def init_params(key, input_dim, n_actions, fc1_dims=256, fc2_dims=256):
    """Deterministic synthetic init (PyTorch-Linear-like uniform fan-in scaling).
    Weights returned transposed to [in, out] for the kernel."""
    ks = jax.random.split(key, 6)

    def lin(kw, kb, fan_in, fan_out):
        bound = 1.0 / jnp.sqrt(fan_in)
        w = jax.random.uniform(kw, (fan_in, fan_out), jnp.float32, -bound, bound)
        b = jax.random.uniform(kb, (1, fan_out), jnp.float32, -bound, bound)
        return w, b

    w1, b1 = lin(ks[0], ks[1], input_dim, fc1_dims)
    w2, b2 = lin(ks[2], ks[3], fc1_dims, fc2_dims)
    w3, b3 = lin(ks[4], ks[5], fc2_dims, n_actions)
    return (w1, b1, w2, b2, w3, b3)


def reference_forward(state, params):
    w1, b1, w2, b2, w3, b3 = params
    h1 = jnp.maximum(state @ w1 + b1, 0.0)
    h2 = jnp.maximum(h1 @ w2 + b2, 0.0)
    logits = h2 @ w3 + b3
    return jax.nn.softmax(logits, axis=1)


if __name__ == "__main__":
    key = jax.random.PRNGKey(0)
    k_params, k_state = jax.random.split(key)

    batch = 8
    input_dim = 32      # e.g. input_dims=(32,)
    n_actions = 6

    params = init_params(k_params, input_dim, n_actions,
                         fc1_dims=256, fc2_dims=256)
    state = jax.random.normal(k_state, (batch, input_dim), jnp.float32)

    prepared, n_act = prepare_params(params)
    probs = actor_forward(state, prepared, n_actions=n_act)
    probs = jax.block_until_ready(probs)

    ref = reference_forward(state, params)   # full-f32 reference
    assert probs.shape == (batch, n_actions)
    # approx-reciprocal softmax: rows still sum to ~1
    assert jnp.allclose(jnp.sum(probs, axis=-1), 1.0, atol=1e-2)
    # bf16 weights + f32 accumulation vs f32 reference: loosened tolerance
    assert jnp.allclose(probs, ref, atol=2e-2, rtol=2e-2)

    print("KERNEL_OK")
</pallas_src>

<mosaic_0001>
module attributes {stable_mosaic.version = 11 : i64} {
  func.func @actor_kernel(%arg0: i32, %arg1: memref<8x32xf32, #tpu.memory_space<vmem>>, %arg2: memref<32x256xbf16, #tpu.memory_space<vmem>>, %arg3: memref<1x256xf32, #tpu.memory_space<vmem>>, %arg4: memref<256x256xbf16, #tpu.memory_space<vmem>>, %arg5: memref<1x256xf32, #tpu.memory_space<vmem>>, %arg6: memref<256x128xbf16, #tpu.memory_space<vmem>>, %arg7: memref<1x128xf32, #tpu.memory_space<vmem>>, %arg8: memref<8x128xf32, #tpu.memory_space<vmem>>) attributes {dimension_semantics = [#tpu.dimension_semantics<parallel>], iteration_bounds = array<i64: 1>, scalar_prefetch = 0 : i64, scratch_operands = 0 : i64, tpu.core_type = #tpu.core_type<tc>, window_params = [{transform_indices = @transform_0, window_bounds = array<i64: 8, 32>}, {pipeline_mode = #tpu.pipeline_mode<synchronous>, transform_indices = @transform_1, window_bounds = array<i64: 32, 256>}, {pipeline_mode = #tpu.pipeline_mode<synchronous>, transform_indices = @transform_2, window_bounds = array<i64: 1, 256>}, {pipeline_mode = #tpu.pipeline_mode<synchronous>, transform_indices = @transform_3, window_bounds = array<i64: 256, 256>}, {pipeline_mode = #tpu.pipeline_mode<synchronous>, transform_indices = @transform_4, window_bounds = array<i64: 1, 256>}, {pipeline_mode = #tpu.pipeline_mode<synchronous>, transform_indices = @transform_5, window_bounds = array<i64: 256, 128>}, {pipeline_mode = #tpu.pipeline_mode<synchronous>, transform_indices = @transform_6, window_bounds = array<i64: 1, 128>}, {transform_indices = @transform_7, window_bounds = array<i64: 8, 128>}]} {
    %c0 = arith.constant 0 : index
    %c0_0 = arith.constant 0 : index
    %0 = vector.load %arg1[%c0, %c0_0] : memref<8x32xf32, #tpu.memory_space<vmem>>, vector<8x32xf32>
    %1 = arith.truncf %0 : vector<8x32xf32> to vector<8x32xbf16>
    %c0_1 = arith.constant 0 : index
    %c0_2 = arith.constant 0 : index
    %2 = vector.load %arg2[%c0_1, %c0_2] : memref<32x256xbf16, #tpu.memory_space<vmem>>, vector<32x256xbf16>
    %cst = arith.constant dense<0.000000e+00> : vector<8x256xf32>
    %3 = tpu.matmul %1, %2, %cst {dimension_numbers = #tpu.dot_dimension_numbers<[1], [0], [0], [1], [0, 0, 1, 1], [], []>} : vector<8x32xbf16>, vector<32x256xbf16>, vector<8x256xf32> -> vector<8x256xf32>
    %c0_3 = arith.constant 0 : index
    %c0_4 = arith.constant 0 : index
    %4 = vector.load %arg3[%c0_3, %c0_4] : memref<1x256xf32, #tpu.memory_space<vmem>>, vector<1x256xf32>
    %5 = vector.broadcast %4 : vector<1x256xf32> to vector<8x256xf32>
    %6 = arith.addf %3, %5 : vector<8x256xf32>
    %cst_5 = arith.constant 0.000000e+00 : f32
    %7 = vector.broadcast %cst_5 : f32 to vector<8x256xf32>
    %8 = arith.maximumf %6, %7 : vector<8x256xf32>
    %9 = arith.truncf %8 : vector<8x256xf32> to vector<8x256xbf16>
    %c0_6 = arith.constant 0 : index
    %c0_7 = arith.constant 0 : index
    %10 = vector.load %arg4[%c0_6, %c0_7] : memref<256x256xbf16, #tpu.memory_space<vmem>>, vector<256x256xbf16>
    %cst_8 = arith.constant dense<0.000000e+00> : vector<8x256xf32>
    %11 = tpu.matmul %9, %10, %cst_8 {dimension_numbers = #tpu.dot_dimension_numbers<[1], [0], [0], [1], [0, 0, 1, 1], [], []>} : vector<8x256xbf16>, vector<256x256xbf16>, vector<8x256xf32> -> vector<8x256xf32>
    %c0_9 = arith.constant 0 : index
    %c0_10 = arith.constant 0 : index
    %12 = vector.load %arg5[%c0_9, %c0_10] : memref<1x256xf32, #tpu.memory_space<vmem>>, vector<1x256xf32>
    %13 = vector.broadcast %12 : vector<1x256xf32> to vector<8x256xf32>
    %14 = arith.addf %11, %13 : vector<8x256xf32>
    %cst_11 = arith.constant 0.000000e+00 : f32
    %15 = vector.broadcast %cst_11 : f32 to vector<8x256xf32>
    %16 = arith.maximumf %14, %15 : vector<8x256xf32>
    %17 = arith.truncf %16 : vector<8x256xf32> to vector<8x256xbf16>
    %c0_12 = arith.constant 0 : index
    %c0_13 = arith.constant 0 : index
    %18 = vector.load %arg6[%c0_12, %c0_13] : memref<256x128xbf16, #tpu.memory_space<vmem>>, vector<256x128xbf16>
    %cst_14 = arith.constant dense<0.000000e+00> : vector<8x128xf32>
    %19 = tpu.matmul %17, %18, %cst_14 {dimension_numbers = #tpu.dot_dimension_numbers<[1], [0], [0], [1], [0, 0, 1, 1], [], []>} : vector<8x256xbf16>, vector<256x128xbf16>, vector<8x128xf32> -> vector<8x128xf32>
    %c0_15 = arith.constant 0 : index
    %c0_16 = arith.constant 0 : index
    %20 = vector.load %arg7[%c0_15, %c0_16] : memref<1x128xf32, #tpu.memory_space<vmem>>, vector<1x128xf32>
    %21 = vector.broadcast %20 : vector<1x128xf32> to vector<8x128xf32>
    %22 = arith.addf %19, %21 : vector<8x128xf32>
    %cst_17 = arith.constant dense<0xFF800000> : vector<8xf32>
    %23 = vector.multi_reduction <maximumf>, %22, %cst_17 [1] : vector<8x128xf32> to vector<8xf32>
    %24 = vector.shape_cast %23 : vector<8xf32> to vector<8x1xf32>
    %25 = vector.broadcast %24 : vector<8x1xf32> to vector<8x128xf32>
    %26 = arith.subf %22, %25 : vector<8x128xf32>
    %27 = math.exp %26 : vector<8x128xf32>
    %cst_18 = arith.constant dense<0.000000e+00> : vector<8xf32>
    %28 = vector.multi_reduction <add>, %27, %cst_18 [1] : vector<8x128xf32> to vector<8xf32>
    %29 = vector.shape_cast %28 : vector<8xf32> to vector<8x1xf32>
    %30 = tpu.reciprocal %29 {approx = true} : vector<8x1xf32> -> vector<8x1xf32>
    %31 = vector.broadcast %30 : vector<8x1xf32> to vector<8x128xf32>
    %32 = arith.mulf %27, %31 : vector<8x128xf32>
    %c0_19 = arith.constant 0 : index
    %c0_20 = arith.constant 0 : index
    %33 = vector.load %arg8[%c0_19, %c0_20] : memref<8x128xf32, #tpu.memory_space<vmem>>, vector<8x128xf32>
    tpu.vector_store %arg8[%c0_19, %c0_20], %32 {strides = array<i32>} : memref<8x128xf32, #tpu.memory_space<vmem>>, vector<8x128xf32>,
    return
  }
  func.func @transform_0(%arg0: i32) -> (i32, i32) {
    %c0_i32 = arith.constant 0 : i32
    %c0_i32_0 = arith.constant 0 : i32
    return %arg0, %c0_i32 : i32, i32
  }
  func.func @transform_1(%arg0: i32) -> (i32, i32) {
    %c0_i32 = arith.constant 0 : i32
    %c0_i32_0 = arith.constant 0 : i32
    %c0_i32_1 = arith.constant 0 : i32
    return %c0_i32, %c0_i32_0 : i32, i32
  }
  func.func @transform_2(%arg0: i32) -> (i32, i32) {
    %c0_i32 = arith.constant 0 : i32
    %c0_i32_0 = arith.constant 0 : i32
    %c0_i32_1 = arith.constant 0 : i32
    return %c0_i32, %c0_i32_0 : i32, i32
  }
  func.func @transform_3(%arg0: i32) -> (i32, i32) {
    %c0_i32 = arith.constant 0 : i32
    %c0_i32_0 = arith.constant 0 : i32
    %c0_i32_1 = arith.constant 0 : i32
    return %c0_i32, %c0_i32_0 : i32, i32
  }
  func.func @transform_4(%arg0: i32) -> (i32, i32) {
    %c0_i32 = arith.constant 0 : i32
    %c0_i32_0 = arith.constant 0 : i32
    %c0_i32_1 = arith.constant 0 : i32
    return %c0_i32, %c0_i32_0 : i32, i32
  }
  func.func @transform_5(%arg0: i32) -> (i32, i32) {
    %c0_i32 = arith.constant 0 : i32
    %c0_i32_0 = arith.constant 0 : i32
    %c0_i32_1 = arith.constant 0 : i32
    return %c0_i32, %c0_i32_0 : i32, i32
  }
  func.func @transform_6(%arg0: i32) -> (i32, i32) {
    %c0_i32 = arith.constant 0 : i32
    %c0_i32_0 = arith.constant 0 : i32
    %c0_i32_1 = arith.constant 0 : i32
    return %c0_i32, %c0_i32_0 : i32, i32
  }
  func.func @transform_7(%arg0: i32) -> (i32, i32) {
    %c0_i32 = arith.constant 0 : i32
    %c0_i32_0 = arith.constant 0 : i32
    return %arg0, %c0_i32 : i32, i32
  }
}

</mosaic_0001>

<bundles_post_ra>
// kernel: actor_forward.1
= control target key start
LH: loop header
LB: loop body
LE: loop exit
PB: predicated region body
PF: predicated region fallthrough
CT: control target
= control target key end

     0   :  { %12 = vsyncpa [#allocation3], 0  ;;  %s961_s0 = inlined_call_operand.hbm [shape: f32[8,32], index: 0, kind: input, shape index: {}]   ;;  %s962_s1 = inlined_call_operand.hbm [shape: bf16[32,256], index: 1, kind: input, shape index: {}]   ;;  %s963_s2 = inlined_call_operand.vmem [shape: f32[1,256], index: 2, kind: input, shape index: {}]   ;;  %s964_s3 = inlined_call_operand.hbm [shape: bf16[256,256], index: 3, kind: input, shape index: {}]   ;;  %s965_s4 = inlined_call_operand.vmem [shape: f32[1,256], index: 4, kind: input, shape index: {}]   ;;  %s966_s5 = inlined_call_operand.hbm [shape: bf16[256,128], index: 5, kind: input, shape index: {}]   ;;  %s967_s6 = inlined_call_operand.vmem [shape: f32[1,128], index: 6, kind: input, shape index: {}]   ;;  %s968_s7 = inlined_call_operand.hbm [shape: f32[8,128], index: 7, kind: output, shape index: {}]  }
   0x1   :  { %13 = vsyncpa [#allocation6], 0 }
   0x2   :  { %14 = vsyncpa [#allocation9], 0 }
   0x3   :  { %15 = vsyncpa [#allocation4], 0  ;;  %s887_s24 = smov [#allocation5]  }
   0x4   :  { %s31_s25 = sshll.u32 %s887_s24, 4  ;;  %s32_s25 = int_to_ptr.vmem [resolvable:$true] %s31_s25 }
   0x5   :  { %s787_s26 = scalar_lea.vmem %s32_s25, 512  ;;  %p792_p1 = scmp.lt.s32.totalorder %s32_s25, %s32_s25 }
   0x6   :  { %p788_p0 = scmp.ne.s32.totalorder %s32_s25, %s787_s26  ;;  %p793_p2 = scmp.lt.s32.totalorder %s787_s26, %s787_s26 }
   0x8   :  { %p794_p3 = por %p793_p2, %p792_p1 }
   0xa   :  { %p795_p4 = pnand %p794_p3, %p788_p0 }
   0xc   :  { %798 = shalt.err (!%p795_p4)
}
   0xd   :  { %s888_s27 = smov 128   ;;  %s889_s28 = smov 8  }
   0xe   :  { %37 = dma.hbm_to_vmem [thread:$0]  %s962_s1, 512, %s32_s25, [#allocation6], %s888_s27, %s888_s27, %s889_s28  }
   0xf   :  { %s890_s8 = smov [#allocation2]   ;;  %s891_s10 = smov [#allocation7]  }
  0x10   :  { %s22_s9 = sshll.u32 %s890_s8, 4  ;;  %s45_s11 = sshll.u32 %s891_s10, 4  ;;  %s23_s9 = int_to_ptr.vmem [resolvable:$true] %s22_s9  ;;  %s46_s11 = int_to_ptr.vmem [resolvable:$true] %s45_s11 }
  0x11   :  { %s807_s12 = scalar_lea.vmem %s23_s9, 128  ;;  %p812_p6 = scmp.lt.s32.totalorder %s23_s9, %s23_s9 }
  0x12   :  { %p808_p5 = scmp.ne.s32.totalorder %s23_s9, %s807_s12  ;;  %p813_p7 = scmp.lt.s32.totalorder %s807_s12, %s807_s12 }
  0x14   :  { %p814_p8 = por %p813_p7, %p812_p6 }
  0x16   :  { %p815_p9 = pnand %p814_p8, %p808_p5 }
  0x18   :  { %818 = shalt.err (!%p815_p9)
}
  0x19   :  { %25 = dma.hbm_to_vmem [thread:$0]  %s961_s0, 128, %s23_s9, [#allocation3]  }
  0x1a   :  { %s827_s15 = scalar_lea.vmem %s46_s11, 4096  ;;  %p832_p11 = scmp.lt.s32.totalorder %s46_s11, %s46_s11 }
  0x1b   :  { %p828_p10 = scmp.ne.s32.totalorder %s46_s11, %s827_s15  ;;  %p833_p12 = scmp.lt.s32.totalorder %s827_s15, %s827_s15 }
  0x1d   :  { %p834_p13 = por %p833_p12, %p832_p11 }
  0x1f   :  { %p835_p0 = pnand %p834_p13, %p828_p10 }
  0x21   :  { %838 = shalt.err (!%p835_p0)
}
  0x22   :  { %51 = dma.hbm_to_vmem [thread:$0]  %s964_s3, 4096, %s46_s11, [#allocation6], %s888_s27, %s888_s27, %s889_s28  }
  0x23   :  { %s892_s17 = smov [#allocation8]  }
  0x24   :  { %s59_s18 = sshll.u32 %s892_s17, 4  ;;  %s60_s18 = int_to_ptr.vmem [resolvable:$true] %s59_s18 }
  0x25   :  { %s847_s19 = scalar_lea.vmem %s60_s18, 2048  ;;  %p852_p2 = scmp.lt.s32.totalorder %s60_s18, %s60_s18 }
  0x26   :  { %p848_p1 = scmp.ne.s32.totalorder %s60_s18, %s847_s19  ;;  %p853_p3 = scmp.lt.s32.totalorder %s847_s19, %s847_s19 }
  0x28   :  { %p854_p4 = por %p853_p3, %p852_p2 }
  0x2a   :  { %p855_p5 = pnand %p854_p4, %p848_p1 }
  0x2c   :  { %858 = shalt.err (!%p855_p5)
}
  0x2d   :  { %s893_s0 = smov 64   ;;  %s894_s20 = smov 4  }
  0x2e   :  { %65 = dma.hbm_to_vmem [thread:$0]  %s966_s5, 2048, %s60_s18, [#allocation9], %s893_s0, %s893_s0, %s894_s20  }
  0x2f   :  { %879 = dma.done.wait [#allocation3], 128  }
  0x30   :  { %880 = vsyncadd [#allocation3], 4294967168 }
  0x31   :  { %881 = dma.done.wait [#allocation6], 4608  }
  0x32   :  { %882 = vsyncadd [#allocation6], 4294962688 }
  0x33   :  { %883 = dma.done.wait [#allocation9], 2048  }
  0x34   :  { %884 = vsyncadd [#allocation9], 4294965248  ;;  %v895_v0 = vmov 0   ;;  %v705_v1 = vld [vmem:[#allocation5 + $0x14] ss:$8 sps:$4 sm:$0xff]   ;;  %vm119_vm0 = vcmask 261120   ;;  %v89_v51 = vlaneseq }
  0x35   :  { %155 = vmatprep.mubr.bf16.mxu0 %v895_v0  ;;  %v707_v2 = vld [vmem:[#allocation5 + $0x10] ss:$8 sps:$4 sm:$0xff]   ;;  %135 = vmatprep.subr.bf16.mxu0 %v705_v1  ;;  %v708_v3 = vld [vmem:[#allocation5 + $0x4] ss:$8 sps:$4 sm:$0xff]   ;;  %v710_v4 = vld [vmem:[#allocation5] ss:$8 sps:$4 sm:$0xff]  }
  0x36   :  { %v81_v5 = vld [vmem:[#allocation2] sm:$0xff]  ;;  %136 = vmatpush1.bf16.msra.mxu0 %v707_v2  ;;  %v714_v8 = vld [vmem:[#allocation7 + $0x64] ss:$8 sps:$4 sm:$0xff]   ;;  %v716_v10 = vld [vmem:[#allocation7 + $0x60] ss:$8 sps:$4 sm:$0xff]   ;;  %v90_v52 = vshrl.u32 %v89_v51, 7 }
  0x37   :  { %v711_v6 = vld [vmem:[#allocation7 + $0x74] ss:$8 sps:$4 sm:$0xff]   ;;  %137 = vmatprep.subr.bf16.mxu0 %v708_v3  ;;  %v713_v7 = vld [vmem:[#allocation7 + $0x70] ss:$8 sps:$4 sm:$0xff]   ;;  %v82_v9 = vpack.c.bf16 %v81_v5, %v81_v5  ;;  %v720_v13 = vld [vmem:[#allocation7 + $0x44] ss:$8 sps:$4 sm:$0xff]  }
  0x38   :  { %372 = vmatprep.subr.bf16.mxu1 %v711_v6  ;;  %v717_v11 = vld [vmem:[#allocation7 + $0x54] ss:$8 sps:$4 sm:$0xff]   ;;  %v719_v12 = vld [vmem:[#allocation7 + $0x50] ss:$8 sps:$4 sm:$0xff]   ;;  %v722_v14 = vld [vmem:[#allocation7 + $0x40] ss:$8 sps:$4 sm:$0xff]  }
  0x39   :  { %373 = vmatpush1.bf16.msra.mxu1 %v713_v7  ;;  %v723_v15 = vld [vmem:[#allocation7 + $0x34] ss:$8 sps:$4 sm:$0xff]   ;;  %v725_v16 = vld [vmem:[#allocation7 + $0x30] ss:$8 sps:$4 sm:$0xff]   ;;  %v726_v17 = vld [vmem:[#allocation7 + $0x24] ss:$8 sps:$4 sm:$0xff]  }
  0x3a   :  { %138 = vmatpush1.bf16.msra.mxu0 %v710_v4  ;;  %374 = vmatprep.subr.bf16.mxu1 %v714_v8  ;;  %v728_v18 = vld [vmem:[#allocation7 + $0x20] ss:$8 sps:$4 sm:$0xff]   ;;  %v729_v19 = vld [vmem:[#allocation7 + $0x14] ss:$8 sps:$4 sm:$0xff]   ;;  %v731_v20 = vld [vmem:[#allocation7 + $0x10] ss:$8 sps:$4 sm:$0xff]  }
  0x3b   :  { %v732_v21 = vld [vmem:[#allocation7 + $0x4] ss:$8 sps:$4 sm:$0xff]   ;;  %v734_v22 = vld [vmem:[#allocation7] ss:$8 sps:$4 sm:$0xff]   ;;  %v735_v23 = vld [vmem:[#allocation7 + $0xf4] ss:$8 sps:$4 sm:$0xff]  }
  0x3c   :  { %v737_v24 = vld [vmem:[#allocation7 + $0xf0] ss:$8 sps:$4 sm:$0xff]   ;;  %v738_v25 = vld [vmem:[#allocation7 + $0xe4] ss:$8 sps:$4 sm:$0xff]   ;;  %v740_v26 = vld [vmem:[#allocation7 + $0xe0] ss:$8 sps:$4 sm:$0xff]  }
  0x3d   :  { %623 = vmatmul.mubr.msk.bf16.vlgmr.msra.gmra.mxu0 %vm119_vm0, %v82_v9  ;;  %375 = vmatpush1.bf16.msra.mxu1 %v716_v10  ;;  %v741_v27 = vld [vmem:[#allocation7 + $0xd4] ss:$8 sps:$4 sm:$0xff]   ;;  %v743_v28 = vld [vmem:[#allocation7 + $0xd0] ss:$8 sps:$4 sm:$0xff]   ;;  %v744_v29 = vld [vmem:[#allocation7 + $0xc4] ss:$8 sps:$4 sm:$0xff]  }
  0x3e   :  { %376 = vmatprep.subr.bf16.mxu1 %v717_v11  ;;  %v746_v30 = vld [vmem:[#allocation7 + $0xc0] ss:$8 sps:$4 sm:$0xff]   ;;  %v747_v31 = vld [vmem:[#allocation7 + $0xb4] ss:$8 sps:$4 sm:$0xff]   ;;  %v749_v32 = vld [vmem:[#allocation7 + $0xb0] ss:$8 sps:$4 sm:$0xff]  }
  0x3f   :  { %v750_v33 = vld [vmem:[#allocation7 + $0xa4] ss:$8 sps:$4 sm:$0xff]   ;;  %v752_v34 = vld [vmem:[#allocation7 + $0xa0] ss:$8 sps:$4 sm:$0xff]   ;;  %v753_v35 = vld [vmem:[#allocation7 + $0x94] ss:$8 sps:$4 sm:$0xff]  }
  0x40   :  { %v755_v36 = vld [vmem:[#allocation7 + $0x90] ss:$8 sps:$4 sm:$0xff]   ;;  %v756_v37 = vld [vmem:[#allocation7 + $0x84] ss:$8 sps:$4 sm:$0xff]   ;;  %v758_v38 = vld [vmem:[#allocation7 + $0x80] ss:$8 sps:$4 sm:$0xff]  }
  0x41   :  { %377 = vmatpush1.bf16.msra.mxu1 %v719_v12  ;;  %v759_v39 = vld [vmem:[#allocation8 + $0x78] sm:$0xff]   ;;  %v761_v41 = vld [vmem:[#allocation8 + $0x70] sm:$0xff]   ;;  %v763_v43 = vld [vmem:[#allocation8 + $0x68] sm:$0xff]   ;;  %v91_v53 = vsub.s32 0, %v90_v52  ;;  %v95_v55 = vsub.s32 1, %v90_v52 }
  0x42   :  { %378 = vmatprep.subr.bf16.mxu1 %v720_v13  ;;  %v760_v40 = vld [vmem:[#allocation8 + $0x38] sm:$0xff]   ;;  %673 = vmatprep.subr.bf16.mxu0 %v759_v39  ;;  %v762_v42 = vld [vmem:[#allocation8 + $0x30] sm:$0xff]   ;;  %v764_v44 = vld [vmem:[#allocation8 + $0x28] sm:$0xff]  }
  0x43   :  { %674 = vmatpush3.bf16.msra.mxu0 %v760_v40  ;;  %v765_v45 = vld [vmem:[#allocation8 + $0x60] sm:$0xff]   ;;  %v767_v47 = vld [vmem:[#allocation8 + $0x58] sm:$0xff]   ;;  %v769_v49 = vld [vmem:[#allocation8 + $0x50] sm:$0xff]  }
  0x44   :  { %675 = vmatprep.subr.bf16.mxu0 %v761_v41  ;;  %v766_v46 = vld [vmem:[#allocation8 + $0x20] sm:$0xff]   ;;  %v768_v48 = vld [vmem:[#allocation8 + $0x18] sm:$0xff]   ;;  %v770_v50 = vld [vmem:[#allocation8 + $0x10] sm:$0xff]  }
  0x45   :  { %379 = vmatpush1.bf16.msra.mxu1 %v722_v14  ;;  %v87_v54 = vld [vmem:[%s963_s2] sm:$0x3]  ;;  %v771_v4 = vld [vmem:[#allocation8 + $0x48] sm:$0xff]   ;;  %v773_v6 = vld [vmem:[#allocation8 + $0x40] sm:$0xff]  }
  0x46   :  { %380 = vmatprep.subr.bf16.mxu1 %v723_v15  ;;  %v92_v56 = vrot.slane %v87_v54, %v91_v53  ;;  %v96_v57 = vrot.slane %v87_v54, %v95_v55  ;;  %v772_v5 = vld [vmem:[#allocation8 + $0x8] sm:$0xff]   ;;  %v774_v7 = vld [vmem:[#allocation8] sm:$0xff]   ;;  %v200_v8 = vld [vmem:[%s965_s4] sm:$0x3]  ;;  %s896_s4 = smov [#allocation10]  }
  0x47   :  { %676 = vmatpush3.bf16.msra.mxu0 %v762_v42  ;;  %v205_v9 = vrot.slane %v200_v8, %v91_v53  ;;  %v209_v10 = vrot.slane %v200_v8, %v95_v55  ;;  %s608_s26 = sshll.u32 %s896_s4, 4  ;;  %s609_s26 = int_to_ptr.vmem [resolvable:$true] %s608_s26 }
  0x48   :  { %677 = vmatprep.subr.bf16.mxu0 %v763_v43  ;;  %p864_p7 = scmp.lt.s32.totalorder %s609_s26, %s609_s26 }
  0x49   :  { %381 = vmatpush1.bf16.msra.mxu1 %v725_v16 }
  0x4a   :  { %382 = vmatprep.subr.bf16.mxu1 %v726_v17 }
  0x4b   :  { %678 = vmatpush3.bf16.msra.mxu0 %v764_v44 }
  0x4c   :  { %679 = vmatprep.subr.bf16.mxu0 %v765_v45 }
  0x4d   :  { %383 = vmatpush1.bf16.msra.mxu1 %v728_v18 }
  0x4e   :  { %384 = vmatprep.subr.bf16.mxu1 %v729_v19 }
  0x4f   :  { %680 = vmatpush3.bf16.msra.mxu0 %v766_v46 }
  0x50   :  { %681 = vmatprep.subr.bf16.mxu0 %v767_v47 }
  0x51   :  { %385 = vmatpush1.bf16.msra.mxu1 %v731_v20 }
  0x52   :  { %386 = vmatprep.subr.bf16.mxu1 %v732_v21 }
  0x53   :  { %682 = vmatpush3.bf16.msra.mxu0 %v768_v48 }
  0x54   :  { %683 = vmatprep.subr.bf16.mxu0 %v769_v49 }
  0x55   :  { %387 = vmatpush1.bf16.msra.mxu1 %v734_v22 }
  0x56   :  { %388 = vmatprep.subr.bf16.mxu1 %v735_v23  ;;  %v656_v23 = vld [vmem:[%s967_s6] ss:$0 sm:$0xff]  ;;  %s859_s6 = scalar_lea.vmem %s609_s26, 128 }
  0x57   :  { %684 = vmatpush3.bf16.msra.mxu0 %v770_v50  ;;  %p860_p6 = scmp.ne.s32.totalorder %s609_s26, %s859_s6  ;;  %p865_p8 = scmp.lt.s32.totalorder %s859_s6, %s859_s6 }
  0x58   :  { %685 = vmatprep.subr.bf16.mxu0 %v771_v4 }
  0x59   :  { %389 = vmatpush2.bf16.msra.mxu1 %v737_v24  ;;  %p866_p9 = por %p865_p8, %p864_p7 }
  0x5a   :  { %390 = vmatprep.subr.bf16.mxu1 %v738_v25 }
  0x5b   :  { %686 = vmatpush3.bf16.msra.mxu0 %v772_v5  ;;  %p867_p10 = pnand %p866_p9, %p860_p6 }
  0x5c   :  { %687 = vmatprep.subr.bf16.mxu0 %v773_v6 }
  0x5d   :  { %391 = vmatpush2.bf16.msra.mxu1 %v740_v26 }
  0x5e   :  { %392 = vmatprep.subr.bf16.mxu1 %v741_v27 }
  0x5f   :  { %688 = vmatpush3.bf16.msra.mxu0 %v774_v7 }
  0x61   :  { %393 = vmatpush2.bf16.msra.mxu1 %v743_v28 }
  0x62   :  { %394 = vmatprep.subr.bf16.mxu1 %v744_v29 }
  0x65   :  { %395 = vmatpush2.bf16.msra.mxu1 %v746_v30 }
  0x66   :  { %396 = vmatprep.subr.bf16.mxu1 %v747_v31 }
  0x69   :  { %397 = vmatpush2.bf16.msra.mxu1 %v749_v32 }
  0x6a   :  { %398 = vmatprep.subr.bf16.mxu1 %v750_v33 }
  0x6d   :  { %399 = vmatpush2.bf16.msra.mxu1 %v752_v34 }
  0x6e   :  { %400 = vmatprep.subr.bf16.mxu1 %v753_v35 }
  0x71   :  { %401 = vmatpush2.bf16.msra.mxu1 %v755_v36 }
  0x72   :  { %402 = vmatprep.subr.bf16.mxu1 %v756_v37 }
  0x75   :  { %403 = vmatpush2.bf16.msra.mxu1 %v758_v38 }
  0xfd   :  { %v157_v58 = vpop.f32.mrf.mxu0 }
  0xfe   :  { %v158_v59 = vadd.f32 %v157_v58, %v92_v56 }
  0xff   :  { %v159_v60 = vpop.f32.mrf.mxu0 }
 0x100   :  { %v160_v61 = vadd.f32 %v159_v60, %v96_v57  ;;  %v164_v62 = vmax.f32 %v158_v59, 0.0 }
 0x101   :  { %v161_v63 = vpop.f32.mrf.mxu0 }
 0x102   :  { %v165_v0 = vmax.f32 %v160_v61, 0.0  ;;  %v166_v3 = vpack.c.bf16 %v164_v62, %v164_v62 }
 0x103   :  { %v162_v1 = vpop.f32.mrf.mxu0 }
 0x104   :  { %v167_v2 = vpack.c.bf16 %v165_v0, %v165_v0 }
 0x106   :  { %404 = vmatprep.mubr.bf16.mxu1 %v167_v2 }
 0x107   :  { %405 = vmatmul.mubr.bf16.vlgmr.msra.gmra.mxu1 %v166_v3 }
 0x1c7   :  { %v406_v11 = vpop.f32.mrf.mxu1 }
 0x1c8   :  { %v407_v12 = vadd.f32 %v406_v11, %v205_v9 }
 0x1c9   :  { %v408_v13 = vpop.f32.mrf.mxu1 }
 0x1ca   :  { %v409_v14 = vadd.f32 %v408_v13, %v209_v10  ;;  %v413_v15 = vmax.f32 %v407_v12, 0.0 }
 0x1cb   :  { %v410_v16 = vpop.f32.mrf.mxu1 }
 0x1cc   :  { %v414_v17 = vmax.f32 %v409_v14, 0.0  ;;  %v415_v20 = vpack.c.bf16 %v413_v15, %v413_v15 }
 0x1cd   :  { %v411_v18 = vpop.f32.mrf.mxu1 }
 0x1ce   :  { %v416_v19 = vpack.c.bf16 %v414_v17, %v414_v17 }
 0x1d0   :  { %584 = vmatprep.mubr.bf16.mxu0 %v416_v19 }
 0x1d1   :  { %585 = vmatmul.mubr.bf16.vlgmr.msra.gmra.mxu0 %v415_v20 }
 0x291   :  { %v689_v21 = vpop.f32.mrf.mxu0 }
 0x293   :  { %v690_v22 = vpop.f32.mrf.mxu0 }
 0x294   :  { %v691_v24 = vadd.f32 %v690_v22, %v689_v21 }
 0x295   :  { %v692_v25 = vpop.f32.mrf.mxu0 }
 0x296   :  { %v587_v26 = vadd.f32 %v691_v24, %v656_v23 }
 0x297   :  { %v693_v27 = vpop.f32.mrf.mxu0 }
 0x298   :  { %592 = vmax.xlane.f32.xlu0 %v587_v26 }
 0x321   :  { %v593_v28 = vpop.xlane.xlu0 %592 }
 0x322   :  { %v594_v29 = vsub.f32 %v587_v26, %v593_v28 }
 0x324   :  { %v595_v30 = vmul.f32 1.442695, %v594_v29 }
 0x326   :  { %775 = vpow2.f32 %v595_v30 }
 0x333   :  { %v776_v31 = vpop.eup %775 }
 0x334   :  { %597 = vadd.xlane.f32.xlu0 %v776_v31 }
 0x3bd   :  { %v598_v32 = vpop.xlane.xlu0 %597 }
 0x3be   :  { %777 = vrcp.f32 %v598_v32 }
 0x3cb   :  { %v778_v33 = vpop.eup %777 }
 0x3cc   :  { %v600_v34 = vmul.f32 %v778_v33, %v776_v31 }
 0x3ce   :  { %601 = vst [vmem:[#allocation10] sm:$0xff] %v600_v34 }
 0x3cf   :  { %870 = shalt.err (!%p867_p10)
}
 0x3d0   :  { %611 = dma.vmem_to_hbm [thread:$0]  %s609_s26, 128, %s968_s7, [#allocation4]  }
 0x3d1   :  { %885 = dma.done.wait [#allocation4], 128  }
 0x3d2   :  { %886 = vsyncadd [#allocation4], 4294967168 }
 0x3d3   :  { %615 = vsyncpa [#allocation3], 1 }
 0x3d4   :  { %616 = vsyncpa [#allocation6], 1 }
 0x3d5   :  { %617 = vsyncpa [#allocation9], 1 }
 0x3d6   :  { %618 = vsyncpa [#allocation4], 1 }

</bundles_post_ra>
